<compile_context>
chip_gen: v5e
topology: v5e:2x2
jax: 0.10.0
libtpu: 0.0.40
codegen_flags: <defaults>
</compile_context>

<pallas_src>
import numpy as np
import jax
import jax.numpy as jnp
from jax.experimental import pallas as pl
from jax.experimental.pallas import tpu as pltpu

IN_FEATURES = 16     # in_features of TreeLSTM
OUT_FEATURES = 32    # out_features of TreeLSTM


def _round_up(x, m):
    return (x + m - 1) // m * m


# ----------------------------------------------------------------------------
# Fused Pallas kernel: grid = (tree, level); one grid step == one tree level
# ----------------------------------------------------------------------------
def _tree_lstm_kernel(node_order_ref, wiou_ref, uiou_ref, uf_ref,
                      gather_ref, parent_ref, wf_ref, hc_ref):
    """
    node_order: (Np, 1)      i32  (-1 padding)
    wiou:       (Np, 3*Hp)   f32  W_iou(x)+b_iou, lane-padded per gate slab
    uiou:       (Hp, 3*Hp)   f32  U_iou^T, zero-padded
    uf:         (Hp, Hp)     f32  U_f^T,   zero-padded
    gather:     (Ep, Np)     f32  per-level child one-hot (padding rows = 0)
    parent:     (Ep, Np)     f32  per-level parent one-hot (padding rows = 0)
    wf:         (Ep, Hp)     f32  per-level W_f(feat[parent])+b_f
    hc:         (Np, 2*Hp)   f32  resident state [h | c] (output accumulator)
    """
    level = pl.program_id(1)
    Hp = uf_ref.shape[0]
    hi = jax.lax.Precision.HIGHEST   # exact f32 state propagation on one-hots

    def gates(iou):
        i = jax.nn.sigmoid(iou[:, 0 * Hp:1 * Hp])
        o = jax.nn.sigmoid(iou[:, 1 * Hp:2 * Hp])
        u = jnp.tanh(iou[:, 2 * Hp:3 * Hp])
        return i, o, u

    node_m = node_order_ref[...] == level            # (Np, 1), lane-broadcasts

    @pl.when(level == 0)
    def _leaves():
        # No children: iou = W_iou(x), c = i*u.  Fully defines hc (zeros
        # elsewhere) -- required because the output buffer starts undefined.
        i, o, u = gates(wiou_ref[...])
        c_new = i * u
        h_new = o * jnp.tanh(c_new)
        hc_new = jnp.concatenate([h_new, c_new], axis=-1)
        hc_ref[...] = jnp.where(node_m, hc_new, jnp.zeros_like(hc_new))

    @pl.when(level > 0)
    def _interior():
        hc = hc_ref[...]                              # (Np, 2*Hp)
        # Child gather of [h | c] in ONE one-hot matmul (exact f32 selection).
        child_hc = jnp.dot(gather_ref[...], hc, precision=hi,
                           preferred_element_type=jnp.float32)   # (Ep, 2*Hp)
        child_h = child_hc[:, :Hp]
        child_c = child_hc[:, Hp:]
        # Forget gate (U_f at default MXU precision per review).
        f = jax.nn.sigmoid(wf_ref[...]
                           + jnp.dot(child_h, uf_ref[...],
                                     preferred_element_type=jnp.float32))
        # Parent segment-sum of [child_h | f*child_c] in ONE matmul, using the
        # (E, N) parent one-hot contracted on the edge axis (scatter = P^T @ x).
        scat_in = jnp.concatenate([child_h, f * child_c], axis=-1)  # (Ep, 2*Hp)
        sums = jax.lax.dot_general(
            parent_ref[...], scat_in,
            dimension_numbers=(((0,), (0,)), ((), ())),
            precision=hi,
            preferred_element_type=jnp.float32)                    # (Np, 2*Hp)
        h_sum = sums[:, :Hp]
        c_sum = sums[:, Hp:]

        iou = wiou_ref[...] + jnp.dot(h_sum, uiou_ref[...],
                                      preferred_element_type=jnp.float32)
        i, o, u = gates(iou)
        c_new = i * u + c_sum
        h_new = o * jnp.tanh(c_new)
        hc_new = jnp.concatenate([h_new, c_new], axis=-1)
        hc_ref[...] = jnp.where(node_m, hc_new, hc)


# ----------------------------------------------------------------------------
# Forward pass wrapper (batched trees; tree structure must be host-static)
# ----------------------------------------------------------------------------
def tree_lstm_forward(features_list, node_order_list, adjacency_list_list,
                      edge_order_list, params):
    """params = (W_iou^T (F,3H), b_iou (1,3H), U_iou^T (H,3H),
                 W_f^T  (F,H),   b_f  (1,H),   U_f^T  (H,H)).
    Tree structure (node_order / adjacency / edge_order) is consumed as
    host-side numpy (it defines grid + padding and cannot be traced)."""
    WiouT, biou, UiouT, WfT, bf, UfT = params
    H = int(UfT.shape[0])
    F = int(WiouT.shape[0])
    Hp = _round_up(H, 128)                      # lane-dense hidden axis
    B = len(features_list)

    node_orders = [np.asarray(no, np.int32) for no in node_order_list]
    adjs = [np.asarray(a, np.int64).reshape(-1, 2) for a in adjacency_list_list]
    eords = [np.asarray(e, np.int32) for e in edge_order_list]
    Ns = [int(no.shape[0]) for no in node_orders]
    L = max(int(no.max()) + 1 for no in node_orders)
    Np = _round_up(max(Ns), 8)
    max_e = 1
    for eo in eords:
        for l in range(1, L):
            max_e = max(max_e, int(np.sum(eo == l)))
    Ep = _round_up(max_e, 8)                    # padded edges per level

    # ---- static structural tables (numpy) ----
    node_order_pad = np.full((B, Np, 1), -1, np.int32)
    gather = np.zeros((B, L * Ep, Np), np.float32)   # child one-hot per level
    parent = np.zeros((B, L * Ep, Np), np.float32)   # parent one-hot per level
    parent_feat_idx = np.zeros((B, L * Ep), np.int64)
    for b in range(B):
        node_order_pad[b, :Ns[b], 0] = node_orders[b]
        for l in range(1, L):
            sel = np.nonzero(eords[b] == l)[0]
            for j, e in enumerate(sel):
                p, ch = int(adjs[b][e, 0]), int(adjs[b][e, 1])
                row = l * Ep + j
                gather[b, row, ch] = 1.0
                parent[b, row, p] = 1.0
                parent_feat_idx[b, row] = p

    # ---- padded features + hoisted, level-invariant W projections ----
    hi = jax.lax.Precision.HIGHEST
    feats_pad = jnp.zeros((B, Np, F), jnp.float32)
    for b in range(B):
        feats_pad = feats_pad.at[b, :Ns[b], :].set(
            jnp.asarray(features_list[b], jnp.float32))

    wiou = jnp.einsum('bnf,fk->bnk', feats_pad, WiouT, precision=hi) + biou
    wiou_x = jnp.zeros((B, Np, 3 * Hp), jnp.float32)
    for g in range(3):                                   # lane-align each gate
        wiou_x = wiou_x.at[:, :, g * Hp:g * Hp + H].set(
            wiou[:, :, g * H:(g + 1) * H])

    pfeat = feats_pad[jnp.arange(B)[:, None], jnp.asarray(parent_feat_idx)]
    wf = jnp.einsum('bef,fk->bek', pfeat, WfT, precision=hi) + bf
    wf_pad = jnp.zeros((B, L * Ep, Hp), jnp.float32).at[:, :, :H].set(wf)

    # ---- lane-padded U weights (zero padding keeps padded lanes at 0) ----
    uiou_pad = jnp.zeros((Hp, 3 * Hp), jnp.float32)
    for g in range(3):
        uiou_pad = uiou_pad.at[:H, g * Hp:g * Hp + H].set(
            UiouT[:, g * H:(g + 1) * H])
    uf_pad = jnp.zeros((Hp, Hp), jnp.float32).at[:H, :H].set(UfT)

    # ---- BlockSpecs ----
    def b_resident(shape):       # per-tree, resident across all levels
        return pl.BlockSpec((None,) + shape,
                            lambda b, l, _s=len(shape): (b,) + (0,) * _s)

    def shared(shape):           # shared weights, resident
        return pl.BlockSpec(shape, lambda b, l, _s=len(shape): (0,) * _s)

    def per_level(shape):        # streamed: one block per (tree, level)
        return pl.BlockSpec((None,) + shape, lambda b, l: (b, l, 0))

    # ---- advisory cost + VMEM sizing ----
    flops = int(B * L * (2 * Ep * Np * 2 * Hp          # gather
                         + 2 * Ep * Hp * Hp            # U_f
                         + 2 * Ep * Np * 2 * Hp        # scatter
                         + 2 * Np * Hp * 3 * Hp))      # U_iou
    transcend = int(B * L * (3 * Np * Hp + Ep * Hp + Np * Hp))
    bytes_acc = int(4 * (B * Np + B * Np * 3 * Hp + Hp * 3 * Hp + Hp * Hp
                         + 2 * B * L * Ep * Np + B * L * Ep * Hp
                         + B * Np * 2 * Hp))
    block_bytes = 4 * (Np + Np * 3 * Hp + Hp * 3 * Hp + Hp * Hp
                       + 2 * Ep * Np + Ep * Hp + Np * 2 * Hp)
    vmem_limit = int(min(max(8 * 1024 * 1024, 4 * block_bytes),
                         100 * 1024 * 1024))

    hc = pl.pallas_call(
        _tree_lstm_kernel,
        out_shape=jax.ShapeDtypeStruct((B, Np, 2 * Hp), jnp.float32),
        grid_spec=pltpu.PrefetchScalarGridSpec(
            num_scalar_prefetch=0,
            grid=(B, L),
            in_specs=[b_resident((Np, 1)),          # node_order
                      b_resident((Np, 3 * Hp)),     # W_iou(x) + b_iou
                      shared((Hp, 3 * Hp)),         # U_iou^T (padded)
                      shared((Hp, Hp)),             # U_f^T   (padded)
                      per_level((Ep, Np)),          # child one-hot (level)
                      per_level((Ep, Np)),          # parent one-hot (level)
                      per_level((Ep, Hp))],         # W_f(parent)+b_f (level)
            out_specs=b_resident((Np, 2 * Hp))),
        compiler_params=pltpu.CompilerParams(
            dimension_semantics=("parallel", "arbitrary"),  # trees || levels seq
            vmem_limit_bytes=vmem_limit),
        cost_estimate=pl.CostEstimate(flops=flops, transcendentals=transcend,
                                      bytes_accessed=bytes_acc),
    )(jnp.asarray(node_order_pad), wiou_x, uiou_pad, uf_pad,
      jnp.asarray(gather), jnp.asarray(parent), wf_pad)

    h = hc[:, :, :H]
    c = hc[:, :, Hp:Hp + H]
    return ([h[b, :Ns[b]] for b in range(B)],
            [c[b, :Ns[b]] for b in range(B)])


# ----------------------------------------------------------------------------
# NumPy reference that follows the PyTorch code literally
# ----------------------------------------------------------------------------
def torch_style_reference(features, node_order, adjacency_list, edge_order,
                          torch_params):
    Wiou, biou, Uiou, Wf, bf, Uf = torch_params   # torch orientation (out, in)
    N = node_order.shape[0]
    H = OUT_FEATURES
    h = np.zeros((N, H), np.float32)
    c = np.zeros((N, H), np.float32)

    def lin(x, W, b=None):
        y = x @ W.T
        return y if b is None else y + b

    def sigmoid(x):
        return 1.0 / (1.0 + np.exp(-x))

    for n in range(int(node_order.max()) + 1):
        node_mask = node_order == n
        edge_mask = edge_order == n
        x = features[node_mask]
        if n == 0:
            iou = lin(x, Wiou, biou)
        else:
            adj = adjacency_list[edge_mask]
            pidx, cidx = adj[:, 0], adj[:, 1]
            child_h, child_c = h[cidx], c[cidx]
            counts, prev = [], None
            for p in pidx:
                if prev is not None and p == prev:
                    counts[-1] += 1
                else:
                    counts.append(1)
                    prev = p
            cuts = np.cumsum(counts)[:-1]
            h_sum = np.stack([s.sum(0) for s in np.split(child_h, cuts)])
            iou = lin(x, Wiou, biou) + lin(h_sum, Uiou)
        i, o, u = np.split(iou, 3, axis=1)
        i, o, u = sigmoid(i), sigmoid(o), np.tanh(u)
        if n == 0:
            c[node_mask] = i * u
        else:
            f = sigmoid(lin(features[pidx], Wf, bf) + lin(child_h, Uf))
            fc = f * child_c
            c_sum = np.stack([s.sum(0) for s in np.split(fc, cuts)])
            c[node_mask] = i * u + c_sum
        h[node_mask] = o * np.tanh(c[node_mask])
    return h, c


# ----------------------------------------------------------------------------
if __name__ == "__main__":
    F, H = IN_FEATURES, OUT_FEATURES
    key = jax.random.PRNGKey(0)
    k1, k2, k3, k4, k5, k6, k7, k8 = jax.random.split(key, 8)

    # Parameters (torch nn.Linear orientation: weight [out, in]).
    Wiou = jax.random.normal(k1, (3 * H, F), jnp.float32) * 0.1
    biou = jax.random.normal(k2, (3 * H,), jnp.float32) * 0.1
    Uiou = jax.random.normal(k3, (3 * H, H), jnp.float32) * 0.1
    Wf = jax.random.normal(k4, (H, F), jnp.float32) * 0.1
    bf = jax.random.normal(k5, (H,), jnp.float32) * 0.1
    Uf = jax.random.normal(k6, (H, H), jnp.float32) * 0.1

    # Tree 0: node 0 -> (1, 2); node 1 -> (3, 4); node 2 -> (5, 6, 7)
    node_order0 = np.array([2, 1, 1, 0, 0, 0, 0, 0], dtype=np.int32)
    adjacency0 = np.array(
        [[0, 1], [0, 2], [1, 3], [1, 4], [2, 5], [2, 6], [2, 7]], dtype=np.int32)
    edge_order0 = node_order0[adjacency0[:, 0]]

    # Tree 1 (different depth/size): 0 -> (1, 2); 1 -> (3); 3 -> (4, 5)
    node_order1 = np.array([3, 2, 0, 1, 0, 0], dtype=np.int32)
    adjacency1 = np.array(
        [[0, 1], [0, 2], [1, 3], [3, 4], [3, 5]], dtype=np.int32)
    edge_order1 = node_order1[adjacency1[:, 0]]

    features0 = jax.random.normal(k7, (node_order0.shape[0], F), jnp.float32)
    features1 = jax.random.normal(k8, (node_order1.shape[0], F), jnp.float32)

    # Kernel-side parameters (pre-transposed; biases as (1, out)).
    params = (Wiou.T, biou[None, :], Uiou.T, Wf.T, bf[None, :], Uf.T)

    h_list, c_list = tree_lstm_forward(
        [features0, features1],
        [node_order0, node_order1],
        [adjacency0, adjacency1],
        [edge_order0, edge_order1],
        params,
    )
    jax.block_until_ready((h_list, c_list))

    # Verify against a literal (PyTorch-semantics) NumPy reference per tree.
    np_params = tuple(np.asarray(p) for p in (Wiou, biou, Uiou, Wf, bf, Uf))
    for feats, no, adj, eo, h_out, c_out in [
        (features0, node_order0, adjacency0, edge_order0, h_list[0], c_list[0]),
        (features1, node_order1, adjacency1, edge_order1, h_list[1], c_list[1]),
    ]:
        h_ref, c_ref = torch_style_reference(np.asarray(feats), no, adj, eo,
                                             np_params)
        # State-carrying dots are f32-exact (HIGHEST); only the U_iou/U_f gate
        # matmuls run at default MXU precision -> tight tolerance.
        np.testing.assert_allclose(np.asarray(h_out), h_ref, rtol=5e-3, atol=5e-3)
        np.testing.assert_allclose(np.asarray(c_out), c_ref, rtol=5e-3, atol=5e-3)

    print("KERNEL_OK")
</pallas_src>

<mosaic_0001>
module attributes {stable_mosaic.version = 11 : i64} {
  func.func @_tree_lstm_kernel(%arg0: i32, %arg1: i32, %arg2: memref<1x8x1xi32, #tpu.memory_space<vmem>>, %arg3: memref<1x8x384xf32, #tpu.memory_space<vmem>>, %arg4: memref<128x384xf32, #tpu.memory_space<vmem>>, %arg5: memref<128x128xf32, #tpu.memory_space<vmem>>, %arg6: memref<1x8x8xf32, #tpu.memory_space<vmem>>, %arg7: memref<1x8x8xf32, #tpu.memory_space<vmem>>, %arg8: memref<1x8x128xf32, #tpu.memory_space<vmem>>, %arg9: memref<1x8x256xf32, #tpu.memory_space<vmem>>) attributes {dimension_semantics = [#tpu.dimension_semantics<parallel>, #tpu.dimension_semantics<arbitrary>], iteration_bounds = array<i64: 2, 4>, scalar_prefetch = 0 : i64, scratch_operands = 0 : i64, tpu.core_type = #tpu.core_type<tc>, window_params = [{transform_indices = @transform_0, window_bounds = array<i64: 1, 8, 1>}, {transform_indices = @transform_1, window_bounds = array<i64: 1, 8, 384>}, {pipeline_mode = #tpu.pipeline_mode<synchronous>, transform_indices = @transform_2, window_bounds = array<i64: 128, 384>}, {pipeline_mode = #tpu.pipeline_mode<synchronous>, transform_indices = @transform_3, window_bounds = array<i64: 128, 128>}, {transform_indices = @transform_4, window_bounds = array<i64: 1, 8, 8>}, {transform_indices = @transform_5, window_bounds = array<i64: 1, 8, 8>}, {transform_indices = @transform_6, window_bounds = array<i64: 1, 8, 128>}, {transform_indices = @transform_7, window_bounds = array<i64: 1, 8, 256>}]} {
    %c0 = arith.constant 0 : index
    %c0_0 = arith.constant 0 : index
    %c0_1 = arith.constant 0 : index
    %0 = vector.load %arg2[%c0, %c0_0, %c0_1] : memref<1x8x1xi32, #tpu.memory_space<vmem>>, vector<1x8x1xi32>
    %1 = vector.shape_cast %0 : vector<1x8x1xi32> to vector<8x1xi32>
    %2 = vector.broadcast %arg1 : i32 to vector<8x1xi32>
    %3 = arith.cmpi eq, %1, %2 : vector<8x1xi32>
    %c0_i32 = arith.constant 0 : i32
    %4 = arith.cmpi eq, %arg1, %c0_i32 : i32
    %5 = arith.extui %4 : i1 to i32
    %c0_i32_2 = arith.constant 0 : i32
    %6 = arith.cmpi ne, %5, %c0_i32_2 : i32
    scf.if %6 {
      %c0_5 = arith.constant 0 : index
      %c0_6 = arith.constant 0 : index
      %c0_7 = arith.constant 0 : index
      %10 = vector.load %arg3[%c0_5, %c0_6, %c0_7] : memref<1x8x384xf32, #tpu.memory_space<vmem>>, vector<1x8x384xf32>
      %11 = vector.shape_cast %10 : vector<1x8x384xf32> to vector<8x384xf32>
      %12 = vector.extract_strided_slice %11 {offsets = [0, 0], sizes = [8, 128], strides = [1, 1]} : vector<8x384xf32> to vector<8x128xf32>
      %13 = arith.negf %12 : vector<8x128xf32>
      %14 = math.exp %13 : vector<8x128xf32>
      %cst = arith.constant 1.000000e+00 : f32
      %15 = vector.broadcast %cst : f32 to vector<8x128xf32>
      %16 = arith.addf %15, %14 : vector<8x128xf32>
      %17 = arith.divf %15, %16 : vector<8x128xf32>
      %18 = vector.extract_strided_slice %11 {offsets = [0, 128], sizes = [8, 128], strides = [1, 1]} : vector<8x384xf32> to vector<8x128xf32>
      %19 = arith.negf %18 : vector<8x128xf32>
      %20 = math.exp %19 : vector<8x128xf32>
      %cst_8 = arith.constant 1.000000e+00 : f32
      %21 = vector.broadcast %cst_8 : f32 to vector<8x128xf32>
      %22 = arith.addf %21, %20 : vector<8x128xf32>
      %23 = arith.divf %21, %22 : vector<8x128xf32>
      %24 = vector.extract_strided_slice %11 {offsets = [0, 256], sizes = [8, 128], strides = [1, 1]} : vector<8x384xf32> to vector<8x128xf32>
      %25 = math.tanh %24 : vector<8x128xf32>
      %26 = arith.mulf %17, %25 : vector<8x128xf32>
      %27 = math.tanh %26 : vector<8x128xf32>
      %28 = arith.mulf %23, %27 : vector<8x128xf32>
      %29 = tpu.concatenate %28, %26 in 1 : vector<8x128xf32>, vector<8x128xf32> -> vector<8x256xf32>
      %cst_9 = arith.constant 0.000000e+00 : f32
      %30 = vector.broadcast %cst_9 : f32 to vector<8x256xf32>
      %31 = vector.shape_cast %3 : vector<8x1xi1> to vector<8x1xi1>
      %32 = vector.broadcast %31 : vector<8x1xi1> to vector<8x256xi1>
      %33 = arith.select %32, %29, %30 : vector<8x256xi1>, vector<8x256xf32>
      %c0_10 = arith.constant 0 : index
      %c0_11 = arith.constant 0 : index
      %c0_12 = arith.constant 0 : index
      %34 = vector.load %arg9[%c0_10, %c0_11, %c0_12] : memref<1x8x256xf32, #tpu.memory_space<vmem>>, vector<1x8x256xf32>
      %35 = vector.shape_cast %34 : vector<1x8x256xf32> to vector<8x256xf32>
      %36 = vector.shape_cast %33 : vector<8x256xf32> to vector<1x8x256xf32>
      tpu.vector_store %arg9[%c0_10, %c0_11, %c0_12], %36 {strides = array<i32>} : memref<1x8x256xf32, #tpu.memory_space<vmem>>, vector<1x8x256xf32>,
    } else {
    }
    %c0_i32_3 = arith.constant 0 : i32
    %7 = arith.cmpi sgt, %arg1, %c0_i32_3 : i32
    %8 = arith.extui %7 : i1 to i32
    %c0_i32_4 = arith.constant 0 : i32
    %9 = arith.cmpi ne, %8, %c0_i32_4 : i32
    scf.if %9 {
      %c0_5 = arith.constant 0 : index
      %c0_6 = arith.constant 0 : index
      %c0_7 = arith.constant 0 : index
      %10 = vector.load %arg9[%c0_5, %c0_6, %c0_7] : memref<1x8x256xf32, #tpu.memory_space<vmem>>, vector<1x8x256xf32>
      %11 = vector.shape_cast %10 : vector<1x8x256xf32> to vector<8x256xf32>
      %c0_8 = arith.constant 0 : index
      %c0_9 = arith.constant 0 : index
      %c0_10 = arith.constant 0 : index
      %12 = vector.load %arg6[%c0_8, %c0_9, %c0_10] : memref<1x8x8xf32, #tpu.memory_space<vmem>>, vector<1x8x8xf32>
      %13 = vector.shape_cast %12 : vector<1x8x8xf32> to vector<8x8xf32>
      %cst = arith.constant dense<0.000000e+00> : vector<8x256xf32>
      %14 = tpu.matmul %13, %11, %cst {dimension_numbers = #tpu.dot_dimension_numbers<[1], [0], [0], [1], [0, 0, 1, 1], [], []>, precision = #tpu.contract_precision<fp32>} : vector<8x8xf32>, vector<8x256xf32>, vector<8x256xf32> -> vector<8x256xf32>
      %15 = vector.extract_strided_slice %14 {offsets = [0, 0], sizes = [8, 128], strides = [1, 1]} : vector<8x256xf32> to vector<8x128xf32>
      %16 = vector.extract_strided_slice %14 {offsets = [0, 128], sizes = [8, 128], strides = [1, 1]} : vector<8x256xf32> to vector<8x128xf32>
      %c0_11 = arith.constant 0 : index
      %c0_12 = arith.constant 0 : index
      %c0_13 = arith.constant 0 : index
      %17 = vector.load %arg8[%c0_11, %c0_12, %c0_13] : memref<1x8x128xf32, #tpu.memory_space<vmem>>, vector<1x8x128xf32>
      %18 = vector.shape_cast %17 : vector<1x8x128xf32> to vector<8x128xf32>
      %c0_14 = arith.constant 0 : index
      %c0_15 = arith.constant 0 : index
      %19 = vector.load %arg5[%c0_14, %c0_15] : memref<128x128xf32, #tpu.memory_space<vmem>>, vector<128x128xf32>
      %cst_16 = arith.constant dense<0.000000e+00> : vector<8x128xf32>
      %20 = tpu.matmul %15, %19, %cst_16 {dimension_numbers = #tpu.dot_dimension_numbers<[1], [0], [0], [1], [0, 0, 1, 1], [], []>} : vector<8x128xf32>, vector<128x128xf32>, vector<8x128xf32> -> vector<8x128xf32>
      %21 = arith.addf %18, %20 : vector<8x128xf32>
      %22 = arith.negf %21 : vector<8x128xf32>
      %23 = math.exp %22 : vector<8x128xf32>
      %cst_17 = arith.constant 1.000000e+00 : f32
      %24 = vector.broadcast %cst_17 : f32 to vector<8x128xf32>
      %25 = arith.addf %24, %23 : vector<8x128xf32>
      %26 = arith.divf %24, %25 : vector<8x128xf32>
      %27 = arith.mulf %26, %16 : vector<8x128xf32>
      %28 = tpu.concatenate %15, %27 in 1 : vector<8x128xf32>, vector<8x128xf32> -> vector<8x256xf32>
      %c0_18 = arith.constant 0 : index
      %c0_19 = arith.constant 0 : index
      %c0_20 = arith.constant 0 : index
      %29 = vector.load %arg7[%c0_18, %c0_19, %c0_20] : memref<1x8x8xf32, #tpu.memory_space<vmem>>, vector<1x8x8xf32>
      %30 = vector.shape_cast %29 : vector<1x8x8xf32> to vector<8x8xf32>
      %cst_21 = arith.constant dense<0.000000e+00> : vector<8x256xf32>
      %31 = tpu.matmul %30, %28, %cst_21 {dimension_numbers = #tpu.dot_dimension_numbers<[0], [0], [1], [1], [0, 1, 1, 1], [], []>, precision = #tpu.contract_precision<fp32>} : vector<8x8xf32>, vector<8x256xf32>, vector<8x256xf32> -> vector<8x256xf32>
      %32 = vector.extract_strided_slice %31 {offsets = [0, 0], sizes = [8, 128], strides = [1, 1]} : vector<8x256xf32> to vector<8x128xf32>
      %33 = vector.extract_strided_slice %31 {offsets = [0, 128], sizes = [8, 128], strides = [1, 1]} : vector<8x256xf32> to vector<8x128xf32>
      %c0_22 = arith.constant 0 : index
      %c0_23 = arith.constant 0 : index
      %c0_24 = arith.constant 0 : index
      %34 = vector.load %arg3[%c0_22, %c0_23, %c0_24] : memref<1x8x384xf32, #tpu.memory_space<vmem>>, vector<1x8x384xf32>
      %35 = vector.shape_cast %34 : vector<1x8x384xf32> to vector<8x384xf32>
      %c0_25 = arith.constant 0 : index
      %c0_26 = arith.constant 0 : index
      %36 = vector.load %arg4[%c0_25, %c0_26] : memref<128x384xf32, #tpu.memory_space<vmem>>, vector<128x384xf32>
      %cst_27 = arith.constant dense<0.000000e+00> : vector<8x384xf32>
      %37 = tpu.matmul %32, %36, %cst_27 {dimension_numbers = #tpu.dot_dimension_numbers<[1], [0], [0], [1], [0, 0, 1, 1], [], []>} : vector<8x128xf32>, vector<128x384xf32>, vector<8x384xf32> -> vector<8x384xf32>
      %38 = arith.addf %35, %37 : vector<8x384xf32>
      %39 = vector.extract_strided_slice %38 {offsets = [0, 0], sizes = [8, 128], strides = [1, 1]} : vector<8x384xf32> to vector<8x128xf32>
      %40 = arith.negf %39 : vector<8x128xf32>
      %41 = math.exp %40 : vector<8x128xf32>
      %cst_28 = arith.constant 1.000000e+00 : f32
      %42 = vector.broadcast %cst_28 : f32 to vector<8x128xf32>
      %43 = arith.addf %42, %41 : vector<8x128xf32>
      %44 = arith.divf %42, %43 : vector<8x128xf32>
      %45 = vector.extract_strided_slice %38 {offsets = [0, 128], sizes = [8, 128], strides = [1, 1]} : vector<8x384xf32> to vector<8x128xf32>
      %46 = arith.negf %45 : vector<8x128xf32>
      %47 = math.exp %46 : vector<8x128xf32>
      %cst_29 = arith.constant 1.000000e+00 : f32
      %48 = vector.broadcast %cst_29 : f32 to vector<8x128xf32>
      %49 = arith.addf %48, %47 : vector<8x128xf32>
      %50 = arith.divf %48, %49 : vector<8x128xf32>
      %51 = vector.extract_strided_slice %38 {offsets = [0, 256], sizes = [8, 128], strides = [1, 1]} : vector<8x384xf32> to vector<8x128xf32>
      %52 = math.tanh %51 : vector<8x128xf32>
      %53 = arith.mulf %44, %52 : vector<8x128xf32>
      %54 = arith.addf %53, %33 : vector<8x128xf32>
      %55 = math.tanh %54 : vector<8x128xf32>
      %56 = arith.mulf %50, %55 : vector<8x128xf32>
      %57 = tpu.concatenate %56, %54 in 1 : vector<8x128xf32>, vector<8x128xf32> -> vector<8x256xf32>
      %58 = vector.shape_cast %3 : vector<8x1xi1> to vector<8x1xi1>
      %59 = vector.broadcast %58 : vector<8x1xi1> to vector<8x256xi1>
      %60 = arith.select %59, %57, %11 : vector<8x256xi1>, vector<8x256xf32>
      %c0_30 = arith.constant 0 : index
      %c0_31 = arith.constant 0 : index
      %c0_32 = arith.constant 0 : index
      %61 = vector.load %arg9[%c0_30, %c0_31, %c0_32] : memref<1x8x256xf32, #tpu.memory_space<vmem>>, vector<1x8x256xf32>
      %62 = vector.shape_cast %61 : vector<1x8x256xf32> to vector<8x256xf32>
      %63 = vector.shape_cast %60 : vector<8x256xf32> to vector<1x8x256xf32>
      tpu.vector_store %arg9[%c0_30, %c0_31, %c0_32], %63 {strides = array<i32>} : memref<1x8x256xf32, #tpu.memory_space<vmem>>, vector<1x8x256xf32>,
    } else {
    }
    return
  }
  func.func @transform_0(%arg0: i32, %arg1: i32) -> (i32, i32, i32) {
    %c0_i32 = arith.constant 0 : i32
    %c0_i32_0 = arith.constant 0 : i32
    %c0_i32_1 = arith.constant 0 : i32
    return %arg0, %c0_i32, %c0_i32_0 : i32, i32, i32
  }
  func.func @transform_1(%arg0: i32, %arg1: i32) -> (i32, i32, i32) {
    %c0_i32 = arith.constant 0 : i32
    %c0_i32_0 = arith.constant 0 : i32
    %c0_i32_1 = arith.constant 0 : i32
    return %arg0, %c0_i32, %c0_i32_0 : i32, i32, i32
  }
  func.func @transform_2(%arg0: i32, %arg1: i32) -> (i32, i32) {
    %c0_i32 = arith.constant 0 : i32
    %c0_i32_0 = arith.constant 0 : i32
    %c0_i32_1 = arith.constant 0 : i32
    return %c0_i32, %c0_i32_0 : i32, i32
  }
  func.func @transform_3(%arg0: i32, %arg1: i32) -> (i32, i32) {
    %c0_i32 = arith.constant 0 : i32
    %c0_i32_0 = arith.constant 0 : i32
    %c0_i32_1 = arith.constant 0 : i32
    return %c0_i32, %c0_i32_0 : i32, i32
  }
  func.func @transform_4(%arg0: i32, %arg1: i32) -> (i32, i32, i32) {
    %c0_i32 = arith.constant 0 : i32
    %c0_i32_0 = arith.constant 0 : i32
    return %arg0, %arg1, %c0_i32 : i32, i32, i32
  }
  func.func @transform_5(%arg0: i32, %arg1: i32) -> (i32, i32, i32) {
    %c0_i32 = arith.constant 0 : i32
    %c0_i32_0 = arith.constant 0 : i32
    return %arg0, %arg1, %c0_i32 : i32, i32, i32
  }
  func.func @transform_6(%arg0: i32, %arg1: i32) -> (i32, i32, i32) {
    %c0_i32 = arith.constant 0 : i32
    %c0_i32_0 = arith.constant 0 : i32
    return %arg0, %arg1, %c0_i32 : i32, i32, i32
  }
  func.func @transform_7(%arg0: i32, %arg1: i32) -> (i32, i32, i32) {
    %c0_i32 = arith.constant 0 : i32
    %c0_i32_0 = arith.constant 0 : i32
    %c0_i32_1 = arith.constant 0 : i32
    return %arg0, %c0_i32, %c0_i32_0 : i32, i32, i32
  }
}

</mosaic_0001>

<bundles_post_ra>
// kernel: tpu_custom_call.1
= control target key start
LH: loop header
LB: loop body
LE: loop exit
PB: predicated region body
PF: predicated region fallthrough
CT: control target
= control target key end

     0   :  { %s2279_s0 = inlined_call_operand.vmem [shape: s32[2,8,1], index: 0, kind: input, shape index: {}]   ;;  %s2280_s1 = inlined_call_operand.vmem [shape: f32[2,8,384], index: 1, kind: input, shape index: {}]   ;;  %s2281_s2 = inlined_call_operand.hbm [shape: f32[128,384], index: 2, kind: input, shape index: {}]   ;;  %s2282_s3 = inlined_call_operand.vmem [shape: f32[128,128], index: 3, kind: input, shape index: {}]   ;;  %s2283_s4 = inlined_call_operand.vmem [shape: f32[2,32,8], index: 4, kind: input, shape index: {}]   ;;  %s2284_s5 = inlined_call_operand.vmem [shape: f32[2,32,8], index: 5, kind: input, shape index: {}]   ;;  %s2285_s6 = inlined_call_operand.hbm [shape: f32[2,32,128], index: 6, kind: input, shape index: {}]   ;;  %s2286_s7 = inlined_call_operand.hbm [shape: f32[2,8,256], index: 7, kind: output, shape index: {}]  }
   0x1   :  { %2297 = sst [smem:[#allocation19_spill]] %s2281_s2 }
   0x2   :  { %2298 = sst [smem:[#allocation20_spill]] %s2282_s3 }
   0x3   :  { %2299 = sst [smem:[#allocation21_spill]] %s2284_s5 }
   0x4   :  { %2300 = sst [smem:[#allocation22_spill]] %s2285_s6 }
   0x5   :  { %2301 = sst [smem:[#allocation23_spill]] %s2286_s7 }
   0x6   :  { %12 = vsyncpa [#allocation3], 0 }
   0x7   :  { %13 = vsyncpa [#allocation6], 0 }
   0x8   :  { %15 = vsyncpa [#allocation6 + $0x1], 0 }
   0x9   :  { %16 = vsyncpa [#allocation4], 0 }
   0xa   :  { %18 = vsyncpa [#allocation4 + $0x1], 0  ;;  %s1929_s24 = smov 0   ;;  %s1931_s25 = smov 0  }
   0xb   :  { %s1933_s26 = smov 0   ;;  %s1935_s27 = smov 0  }
   0xc   :  { %s1937_s28 = smov 0   ;;  %s1939_s29 = smov 0  }
   0xd   :  { %s1941_s30 = smov 0   ;;  %s1943_s8 = smov 0  }
   0xe   :  { %s1945_s9 = smov 0   ;;  %s1947_s10 = smov 0  }
   0xf   :  { %s1949_s11 = smov 0  }
  0x10 LB: > { %2302 = sst [smem:[#allocation11_spill]] %s1842_s24  ;;  %s1516_s12 = sadd.s32 4294967295, %s1882_s11   ;;  %s1882_s11 = sphi %s1949_s11, %s24_s11   ;;  %s1878_s10 = sphi %s1947_s10, %s2334_s10   ;;  %s1874_s9 = sphi %s1945_s9, %s2333_s9   ;;  %s1870_s8 = sphi %s1943_s8, %s2332_s8   ;;  %s1866_s30 = sphi %s1941_s30, %s2340_s30   ;;  %s1862_s29 = sphi %s1939_s29, %s2339_s29   ;;  %s1858_s28 = sphi %s1937_s28, %s2338_s28   ;;  %s1854_s27 = sphi %s1935_s27, %s2337_s27   ;;  %s1850_s26 = sphi %s1933_s26, %s2330_s26   ;;  %s1846_s25 = sphi %s1931_s25, %s2336_s25   ;;  %s1842_s24 = sphi %s1929_s24, %s2335_s24  }
  0x11   : > { %2303 = sst [smem:[#allocation12_spill]] %s1850_s26  ;;  %p1518_p0 = scmp.ge.s32.totalorder %s1882_s11, 1 }
  0x12   : > { %2304 = sst [smem:[#allocation13_spill]] %s1874_s9  ;;  %p1986_p1 = scmp.eq.s32.totalorder %s1516_s12, 0 }
  0x13   : > { %2305 = sst [smem:[#allocation14_spill]] %s1878_s10  ;;  %p1990_p2 = scmp.eq.s32.totalorder %s1516_s12, 7 }
  0x14   : > { %p245_p3 = scmp.lt.s32.totalorder %s1882_s11, 9  ;;  %s2308_s2 = sld [smem:[#allocation19_spill]] }
  0x15   : > { %s1884_s19 = smov [#allocation2]   ;;  %s1885_s21 = smov 384  }
  0x16   : > { %p1998_p4 = pnand %p1518_p0, %p245_p3  ;;  %s258_s20 = sshll.u32 %s1884_s19, 4  ;;  %s259_s20 = int_to_ptr.vmem [resolvable:$true] %s258_s20 }
  0x17   : > { %s1886_s22 = smov 24   ;;  %s1517_s23 = sadd.s32 4294967294, %s1882_s11  }
  0x18   : > { %p1556_p5 = pneg %p1998_p4  ;;  %s33_s12 = sadd.s32 1, %s1874_s9 }
  0x19   : > { %p34_p7 = scmp.ge.s32.totalorder %s33_s12, 4  ;;  %s36_s15 = sadd.s32 1, %s1878_s10 }
  0x1a   : > { %s256_s17 = sshll.u32 %s2308_s2, 4  ;;  %p1557_p6 = pnand %p1556_p5, %p1986_p1  ;;  %s257_s17 = int_to_ptr.hbm [resolvable:$true] %s256_s17 }
  0x1b   : > { %s195_s16 = sadd.s32 1, %s1862_s29  ;;  %p202_p8 = scmp.ne.s32.totalorder %s1862_s29, %s1858_s28 }
  0x1c   : > { %1559 = dma.hbm_to_vmem [thread:$0]  (!%p1557_p6), %s257_s17, 6144, %s259_s20, [#allocation3], %s1885_s21, %s1885_s21, %s1886_s22  }
  0x1d   : > { %s2342_s12 = smov (%p34_p7, %s33_s12), 0  ;;  %s2344_s15 = smov (!%p34_p7, %s36_s15), %s1878_s10 }
  0x1e   : > { %2310 = sst [smem:[#allocation15_spill]] %s2342_s12  ;;  %s191_s19 = ssub.s32 %s1874_s9, %s2342_s12 }
  0x1f   : > { %p203_p9 = scmp.eq.s32.totalorder %s1882_s11, 0  ;;  %p38_p10 = scmp.ge.s32.totalorder %s2344_s15, 2 }
  0x20   : > { %p208_p11 = scmp.ne.s32.totalorder %s1858_s28, %s1854_s27  ;;  %s221_s20 = sadd.s32 1, %s1850_s26 }
  0x21   : > { %p2020_p12 = por %p203_p9, %p202_p8  ;;  %s2346_s15 = smov (%p38_p10, %s2344_s15), 0 }
  0x22   : > { %2312 = sst [smem:[#allocation16_spill]] %s2346_s15  ;;  %p2029_p13 = por %p1986_p1, %p208_p11 }
  0x23   : > { %p231_p0 = scmp.ne.s32.totalorder %s1850_s26, %s1846_s25  ;;  %s190_s22 = ssub.s32 %s1878_s10, %s2346_s15 }
  0x24   : > { %p237_p3 = scmp.ne.s32.totalorder %s1846_s25, %s1842_s24  ;;  %s192_s27 = sor.u32 %s191_s19, %s190_s22 }
  0x25   : > { %p219_p5 = scmp.eq.s32.totalorder %s190_s22, 0  ;;  %p193_p6 = scmp.eq.s32.totalorder %s192_s27, 0 }
  0x26   : > { %p2041_p7 = por %p1990_p2, %p231_p0  ;;  %p238_p8 = scmp.eq.s32.totalorder %s1517_s23, 7 }
  0x27   : > { %s2046_s12 = scalar_select %p219_p5, %s1850_s26, %s221_s20  }
  0x28   : > { %s2314_s2 = scalar_select %p2041_p7, 1, 0 }
  0x29   : > { %2316 = sst [smem:[#allocation18_spill]] %s2046_s12  ;;  %p1569_p9 = scmp.lt.s32.totalorder %s1882_s11, 8 }
  0x2a   : > { %2315 = sst [smem:[#allocation17_spill]] %s2314_s2  ;;  %s312_s3 = sand.u32 1, %s1862_s29  }
  0x2b   : > { %s2049_s7 = scalar_select %p193_p6, %s1862_s29, %s195_s16  }
  0x2c   : > { %s1522_s5 = sshll.u32 %s1878_s10, 2  ;;  %p2054_p10 = por %p238_p8, %p237_p3 }
  0x2d   : > { %s1521_s19 = sshll.u32 %s312_s3, 3  ;;  %s320_s14 = sadd.s32 %s1874_s9, %s1522_s5 }
  0x2e   : > { %s1523_s22 = sshll.u32 %s320_s14, 3  ;;  %s2318_s6 = sld [smem:[#allocation22_spill]] }
  0x2f   : > { %s316_s12 = scalar_lea.vmem [#allocation5], %s1521_s19  ;;  %p1561_p2 = pnand %p1569_p9, %p2020_p12 }
  0x30   : > { %s326_s26 = sshll.u32 %s316_s12, 4  ;;  %s313_s23 = scalar_lea.sflag [#allocation6], %s312_s3  ;;  %s327_s26 = int_to_ptr.vmem [resolvable:$true] %s326_s26 }
  0x32   : > { %335 = sbr.rel (%p1998_p4) target bundleno = 756 (0x2f4), region = 48 }
  0x34   : > { %s322_s20 = scalar_lea.hbm %s2318_s6, %s1523_s22 }
  0x35   : > { %s324_s2 = sshll.u32 %s322_s20, 4  ;;  %s325_s2 = int_to_ptr.hbm [resolvable:$true] %s324_s2 }
  0x36   : > { %1563 = dma.hbm_to_vmem [thread:$0]  (!%p1561_p2), %s325_s2, 128, %s327_s26, %s313_s23  }
  0x37   : > { %1829 = dma.done.wait (%p1986_p1), [#allocation3], 6144  }
  0x38   : > { %1831 = vsyncadd (%p1986_p1), [#allocation3], 4294961152  ;;  %s342_s5 = sand.u32 1, %s1858_s28  }
  0x39   : > { %s2073_s24 = sshll.u32 %s342_s5, 3  ;;  %s343_s12 = scalar_lea.sflag [#allocation6], %s342_s5 }
  0x3a   : > { %1833 = dma.done.wait (%p2029_p13), %s343_s12, 128  }
  0x3b   : > { %1835 = vsyncadd (%p2029_p13), %s343_s12, 4294967168  ;;  %p403_p1 = scmp.lt.s32.totalorder %s1870_s8, 1  ;;  %p414_p4 = scmp.lt.s32.totalorder %s1866_s30, 3  ;;  %v429_v0 = vstv %s1866_s30 }
  0x3c   : > { %s400_s2 = sand.u32 1, %s1846_s25   ;;  %p1534_p11 = scmp.ne.s32.totalorder %s1866_s30, 0 }
  0x3d   : > { %s404_s3 = scalar_select %p403_p1, %s1870_s8, 1 }
  0x3e   : > { %s415_s26 = scalar_select %p414_p4, %s1866_s30, 3 }
  0x3f   : > { %s1528_s13 = sshll.u32 %s404_s3, 3  ;;  %s1547_s18 = smul.u32 24, %s404_s3 }
  0x40   : > { %s406_s14 = scalar_lea.vmem %s2279_s0, %s1528_s13  ;;  %s1530_s21 = sshll.u32 %s404_s3, 2 }
  0x41   : > { %s2092_s20 = scalar_lea.vmem %s2280_s1, %s1547_s18  ;;  %s417_s23 = sadd.s32 %s1530_s21, %s415_s26  ;;  %v428_v1 = vld [vmem:[%s406_s14] sm:$0xff] }
  0x42   : > { %s1531_s5 = sshll.u32 %s417_s23, 3  ;;  %s1527_s12 = sshll.u32 %s400_s2, 4  ;;  %vm2106_vm0 = vcmp.eq.s32.totalorder %v428_v1, %v429_v0 }
  0x43   : > { %s2099_s10 = scalar_lea.vmem %s2283_s4, %s1531_s5  ;;  %s2319_s13 = sld [smem:[#allocation21_spill]] }
  0x44   : > { %s2110_s18 = scalar_lea.vmem [#allocation7], %s1527_s12 }
  0x45   : > { %434 = sbr.rel (%p1534_p11) target bundleno = 195 (0xc3), region = 60 }
  0x49   : > { %s2104_s3 = scalar_lea.vmem %s2319_s13, %s1531_s5 }
  0x4a   : > { %v1887_v3 = vmov 0   ;;  %v435_v5 = vld [vmem:[%s2092_s20] sm:$0xff]  ;;  %v436_v8 = vld [vmem:[%s2092_s20 + $0x8] sm:$0xff]  ;;  %v437_v18 = vld [vmem:[%s2092_s20 + $0x10] sm:$0xff] }
  0x4b   : > { %1666 = vset.pattern.permute.xlu0 %v1887_v3  ;;  %v480_v4 = vsel %vm2106_vm0, 1, %v1887_v3  ;;  %v1535_v6 = vmul.f32 -1.442695, %v435_v5  ;;  %v1536_v10 = vmul.f32 -1.442695, %v436_v8 }
  0x4c   : > { %482 = vperm.xlu0 %1666, %v480_v4  }
  0x4d   : > { %1667 = vpow2.f32 %v1535_v6 }
  0x53   : > { %v1668_v7 = vpop.eup %1667 }
  0x54   : > { %v441_v9 = vadd.f32 1.0, %v1668_v7 }
  0x56   : > { %1669 = vrcp.f32 %v441_v9  ;;  %vm447_vm1 = vweird.f32 %v441_v9  ;;  %v453_v19 = vand.u32 2147483648, %v441_v9  ;;  %v451_v21 = vand.u32 2147483647, %v441_v9 }
  0x57   : > { %1671 = vpow2.f32 %v1536_v10 }
  0x58   : > { %v454_v23 = vor.u32 1.1754944e-38, %v453_v19  ;;  %vm452_vm4 = vcmp.eq.f32.partialorder %v451_v21, 8.507059e+37 }
  0x5c   : > { %v1670_v11 = vpop.eup %1669 }
  0x5d   : > { %v1672_v12 = vpop.eup %1671  ;;  %v443_v13 = vmul.f32 %v1670_v11, %v441_v9  ;;  %vm448_vm2 = vweird.f32 %v1670_v11 }
  0x5e   : > { %v460_v14 = vadd.f32 1.0, %v1672_v12  ;;  %vm449_vm3 = vmor %vm447_vm1, %vm448_vm2 }
  0x5f   : > { %v444_v15 = vsub.f32 1.0, %v443_v13 }
  0x60   : > { %1673 = vrcp.f32 %v460_v14  ;;  %vm466_vm5 = vweird.f32 %v460_v14  ;;  %v472_v30 = vand.u32 2147483648, %v460_v14  ;;  %v470_v32 = vand.u32 2147483647, %v460_v14 }
  0x61   : > { %v445_v16 = vmul.f32 %v1670_v11, %v444_v15  ;;  %1675 = vtanh.f32 %v437_v18 }
  0x62   : > { %v473_v33 = vor.u32 1.1754944e-38, %v472_v30  ;;  %vm471_vm8 = vcmp.eq.f32.partialorder %v470_v32, 8.507059e+37 }
  0x63   : > { %v446_v20 = vadd.f32 %v1670_v11, %v445_v16 }
  0x65   : > { %v450_v24 = vsel %vm449_vm3, %v1670_v11, %v446_v20 }
  0x66   : > { %v1674_v17 = vpop.eup %1673  ;;  %v455_v27 = vsel %vm452_vm4, %v454_v23, %v450_v24 }
  0x67   : > { %v462_v22 = vmul.f32 %v1674_v17, %v460_v14  ;;  %v1676_v26 = vpop.eup %1675  ;;  %vm467_vm6 = vweird.f32 %v1674_v17 }
  0x68   : > { %v477_v29 = vmul.f32 %v1676_v26, %v455_v27  ;;  %vm468_vm7 = vmor %vm466_vm5, %vm467_vm6 }
  0x69   : > { %v463_v25 = vsub.f32 1.0, %v462_v22 }
  0x6a   : > { %1677 = vtanh.f32 %v477_v29 }
  0x6b   : > { %v464_v28 = vmul.f32 %v1674_v17, %v463_v25 }
  0x6d   : > { %v465_v31 = vadd.f32 %v1674_v17, %v464_v28 }
  0x6f   : > { %v469_v34 = vsel %vm468_vm7, %v1674_v17, %v465_v31 }
  0x70   : > { %v1678_v35 = vpop.eup %1677  ;;  %v474_v36 = vsel %vm471_vm8, %v473_v33, %v469_v34 }
  0x71   : > { %v479_v37 = vmul.f32 %v1678_v35, %v474_v36 }
  0xbe   : > { %v483_v38 = vpop.permute.xlu0 %482 }
  0xbf   : > { %vm484_vm9 = vcmp.eq.s32.totalorder %v483_v38, 1 }
  0xc0   : > { %v485_v39 = vsel %vm484_vm9, %v479_v37, 0.0  ;;  %v486_v40 = vsel %vm484_vm9, %v477_v29, 0.0 }
  0xc1   : > { %487 = vst [vmem:[%s2110_s18] sm:$0xff] %v485_v39 }
  0xc2   : > { %488 = vst [vmem:[%s2110_s18 + $0x8] sm:$0xff] %v486_v40 }
  0xc3 PF: > { %p1537_p12 = scmp.le.s32.totalorder %s1866_s30, 0 }
  0xc4   : > { %s2322_s9 = sld [smem:[#allocation20_spill]] (!%p1537_p12)  ;;  %s2324_s30 = scalar_lea.vmem (!%p1537_p12), [#allocation5], %s2073_s24 }
  0xc5   : > { %492 = sbr.rel (%p1537_p12) target bundleno = 736 (0x2e0), region = 64 }
  0xca   : > { %v2122_v41 = vld [vmem:[%s2110_s18] sm:$0xff]  ;;  %vm496_vm10 = vcmask 64512   ;;  %v2130_v49 = vld [vmem:[%s2110_s18 + $0x8] sm:$0xff]  ;;  %s2323_s16 = smov %s2322_s9 }
  0xcb   : > { %v495_v42 = vld [vmem:[%s2099_s10] sm:$0xff]  ;;  %v515_v44 = vand.u32 4294901760, %v2122_v41  ;;  %v661_v51 = vand.u32 4294901760, %v2130_v49  ;;  %v808_v59 = vld [vmem:[%s2322_s9 + $0x78] sm:$0xff]  ;;  %v807_v60 = vld [vmem:[%s2323_s16 + $0x70] sm:$0xff] }
  0xcc   : > { %v850_v43 = vld [vmem:[%s2104_s3] sm:$0xff]  ;;  %v498_v45 = vsel %vm496_vm10, %v495_v42, 0  ;;  %v806_v61 = vld [vmem:[%s2323_s16 + $0x68] sm:$0xff]  ;;  %v804_v63 = vld [vmem:[%s2323_s16 + $0x58] sm:$0xff] }
  0xcd   : > { %851 = vxpose.xlu0.b32.start.end [1/1] (short) (narrow) %v850_v43, 8  ;;  %v517_v46 = vand.u32 4294901760, %v498_v45  ;;  %516 = vmatpush.msra.mxu3 %v515_v44  ;;  %v542_v47 = vsub.f32 %v2122_v41, %v515_v44  ;;  %v688_v54 = vsub.f32 %v2130_v49, %v661_v51  ;;  %v805_v62 = vld [vmem:[%s2323_s16 + $0x60] sm:$0xff]  ;;  %v803_v0 = vld [vmem:[%s2323_s16 + $0x50] sm:$0xff]  ;;  %v802_v1 = vld [vmem:[%s2323_s16 + $0x48] sm:$0xff] }
  0xce   : > { %640 = vmatpush.msra.mxu1 %v515_v44  ;;  %662 = vmatpush.msra.mxu2 %v661_v51  ;;  %v801_v5 = vld [vmem:[%s2323_s16 + $0x40] sm:$0xff]  ;;  %v800_v6 = vld [vmem:[%s2323_s16 + $0x38] sm:$0xff]  ;;  %v799_v7 = vld [vmem:[%s2323_s16 + $0x30] sm:$0xff] }
  0xcf   : > { %v518_v48 = vsub.f32 %v498_v45, %v517_v46  ;;  %642 = vmatmul.f32.vlgmr.msra.gmra.mxu1 %v517_v46  ;;  %v543_v50 = vand.u32 4294901760, %v542_v47  ;;  %v689_v57 = vand.u32 4294901760, %v688_v54  ;;  %v798_v8 = vld [vmem:[%s2323_s16 + $0x28] sm:$0xff]  ;;  %v797_v9 = vld [vmem:[%s2323_s16 + $0x20] sm:$0xff]  ;;  %v796_v10 = vld [vmem:[%s2323_s16 + $0x18] sm:$0xff] }
  0xd0   : > { %738 = vmatpush.msrb.mxu1 %v661_v51  ;;  %v795_v11 = vld [vmem:[%s2323_s16 + $0x10] sm:$0xff]  ;;  %v794_v12 = vld [vmem:[%s2323_s16 + $0x8] sm:$0xff]  ;;  %v793_v13 = vld [vmem:[%s2323_s16] sm:$0xff] }
  0xd1   : > { %v519_v52 = vand.u32 4294901760, %v518_v48  ;;  %v544_v53 = vsub.f32 %v542_v47, %v543_v50  ;;  %618 = vmatpush.msra.mxu0 %v543_v50  ;;  %764 = vmatpush.msrb.mxu2 %v689_v57  ;;  %v690_v3 = vsub.f32 %v688_v54, %v689_v57  ;;  %v1226_v37 = vld [vmem:[#allocation2 + $0x168] sm:$0xff]  ;;  %v1223_v38 = vld [vmem:[#allocation2 + $0x150] sm:$0xff]  ;;  %v1220_v39 = vld [vmem:[#allocation2 + $0x138] sm:$0xff] }
  0xd2   : > { %620 = vmatmul.f32.vlgmr.msra.gmra.mxu0 %v517_v46  ;;  %v1217_v40 = vld [vmem:[#allocation2 + $0x120] sm:$0xff]  ;;  %v1214_v42 = vld [vmem:[#allocation2 + $0x108] sm:$0xff]  ;;  %v1211_v43 = vld [vmem:[#allocation2 + $0xf0] sm:$0xff] }
  0xd3   : > { %v520_v55 = vsub.f32 %v518_v48, %v519_v52  ;;  %v545_v56 = vand.u32 4294901760, %v544_v53  ;;  %715 = vmatpush.msrb.mxu0 %v688_v54  ;;  %v691_v4 = vand.u32 4294901760, %v690_v3  ;;  %v1205_v45 = vld [vmem:[#allocation2 + $0xc0] sm:$0xff]  ;;  %v1196_v50 = vld [vmem:[#allocation2 + $0x78] sm:$0xff]  ;;  %v1187_v53 = vld [vmem:[#allocation2 + $0x30] sm:$0xff] }
  0xd4   : > { %v1200_v2 = vld [vmem:[#allocation2 + $0x98] sm:$0xff] }
  0xd5   : > { %v521_v58 = vand.u32 4294901760, %v520_v55  ;;  %546 = vmatpush.msrb.mxu3 %v545_v56  ;;  %809 = vmatpush.msra.mxu0 %v808_v59  ;;  %v792_v55 = vld [vmem:[%s2324_s30] sm:$0xff]  ;;  %v1184_v56 = vld [vmem:[#allocation2 + $0x18] sm:$0xff] }
  0xd7   : > { %522 = vmatmul.f32.vlgmr.msra.gmra.mxu3 %v521_v58  ;;  %668 = vmatmul.f32.vlgmr.msra.gmra.mxu2 %v521_v58 }
  0xd8   : > { %569 = vmatpush.msra.mxu3 %v542_v47  ;;  %742 = vmatmul.f32.vlgmr.msrb.gmra.mxu1 %v519_v52  ;;  %v1199_v47 = vld [vmem:[#allocation2 + $0x90] sm:$0xff] }
  0xd9   : > { %810 = vmatpush.msra.mxu0 %v807_v60  ;;  %v1181_v60 = vld [vmem:[#allocation2] sm:$0xff] }
  0xda   : > { %718 = vmatmul.f32.vlgmr.msrb.gmra.mxu0 %v518_v48 }
  0xdb   : > { %811 = vmatpush.msra.mxu0 %v806_v61 }
  0xdd   : > { %812 = vmatpush.msra.mxu0 %v805_v62 }
  0xdf   : > { %548 = vmatmul.f32.vlgmr.msrb.gmra.mxu3 %v517_v46  ;;  %766 = vmatmul.f32.vlgmr.msrb.gmra.mxu2 %v517_v46 }
  0xe0   : > { %592 = vmatpush.msrb.mxu3 %v515_v44  ;;  %813 = vmatpush.msra.mxu0 %v804_v63  ;;  %v1208_v44 = vld [vmem:[#allocation2 + $0xd8] sm:$0xff] }
  0xe2   : > { %814 = vmatpush.msra.mxu0 %v803_v0 }
  0xe4   : > { %815 = vmatpush.msra.mxu0 %v802_v1 }
  0xe6   : > { %816 = vmatpush.msra.mxu0 %v801_v5 }
  0xe7   : > { %572 = vmatmul.f32.vlgmr.msra.gmra.mxu3 %v518_v48 }
  0xe8   : > { %692 = vmatpush.msra.mxu3 %v691_v4  ;;  %817 = vmatpush.msra.mxu0 %v800_v6 }
  0xea   : > { %818 = vmatpush.msra.mxu0 %v799_v7 }
  0xec   : > { %819 = vmatpush.msra.mxu0 %v798_v8 }
  0xee   : > { %820 = vmatpush.msra.mxu0 %v797_v9 }
  0xef   : > { %596 = vmatmul.f32.vlgmr.msrb.gmra.mxu3 %v519_v52  ;;  %v1190_v52 = vld [vmem:[#allocation2 + $0x48] sm:$0xff] }
  0xf0   : > { %786 = vmatpush.msrb.mxu3 %v661_v51  ;;  %821 = vmatpush.msra.mxu0 %v796_v10  ;;  %v1193_v51 = vld [vmem:[#allocation2 + $0x60] sm:$0xff] }
  0xf2   : > { %822 = vmatpush.msra.mxu0 %v795_v11 }
  0xf4   : > { %823 = vmatpush.msra.mxu0 %v794_v12 }
  0xf6   : > { %824 = vmatpush.msra.mxu0 %v793_v13 }
  0xf7   : > { %694 = vmatmul.f32.vlgmr.msra.gmra.mxu3 %v517_v46 }
  0xf8   : > { %1229 = vmatpush.msrb.mxu0 %v1226_v37  ;;  %v1227_v37 = vld [vmem:[#allocation2 + $0x170] sm:$0xff] }
  0xfa   : > { %1230 = vmatpush.msrb.mxu0 %v1223_v38  ;;  %v1224_v38 = vld [vmem:[#allocation2 + $0x158] sm:$0xff] }
  0xfc   : > { %1231 = vmatpush.msrb.mxu0 %v1220_v39 }
  0xfe   : > { %1232 = vmatpush.msrb.mxu0 %v1217_v40  ;;  %v1221_v40 = vld [vmem:[#allocation2 + $0x140] sm:$0xff] }
  0xff   : > { %788 = vmatmul.f32.vlgmr.msrb.gmra.mxu3 %v517_v46  ;;  %v1202_v46 = vld [vmem:[#allocation2 + $0xa8] sm:$0xff] }
 0x100   : > { %1233 = vmatpush.msrb.mxu0 %v1214_v42 }
 0x102   : > { %1234 = vmatpush.msrb.mxu0 %v1211_v43 }
 0x104   : > { %1235 = vmatpush.msrb.mxu0 %v1208_v44  ;;  %v1218_v44 = vld [vmem:[#allocation2 + $0x128] sm:$0xff] }
 0x106   : > { %1236 = vmatpush.msrb.mxu0 %v1205_v45  ;;  %v1215_v45 = vld [vmem:[#allocation2 + $0x110] sm:$0xff] }
 0x108   : > { %1237 = vmatpush.msrb.mxu0 %v1202_v46  ;;  %v1228_v46 = vld [vmem:[#allocation2 + $0x178] sm:$0xff] }
 0x10a   : > { %1238 = vmatpush.msrb.mxu0 %v1199_v47  ;;  %v1225_v47 = vld [vmem:[#allocation2 + $0x160] sm:$0xff] }
 0x10c   : > { %1239 = vmatpush.msrb.mxu0 %v1196_v50  ;;  %v1209_v50 = vld [vmem:[#allocation2 + $0xe0] sm:$0xff] }
 0x10e   : > { %1240 = vmatpush.msrb.mxu0 %v1193_v51  ;;  %v1222_v51 = vld [vmem:[#allocation2 + $0x148] sm:$0xff] }
 0x110   : > { %1241 = vmatpush.msrb.mxu0 %v1190_v52  ;;  %v1206_v52 = vld [vmem:[#allocation2 + $0xc8] sm:$0xff] }
 0x112   : > { %1242 = vmatpush.msrb.mxu0 %v1187_v53  ;;  %v1219_v53 = vld [vmem:[#allocation2 + $0x130] sm:$0xff] }
 0x114   : > { %1243 = vmatpush.msrb.mxu0 %v1184_v56  ;;  %v1197_v56 = vld [vmem:[#allocation2 + $0x80] sm:$0xff] }
 0x116   : > { %1244 = vmatpush.msrb.mxu0 %v1181_v60  ;;  %v1191_v60 = vld [vmem:[#allocation2 + $0x50] sm:$0xff] }
 0x14c   : > { %v643_v25 = vpop.f32.mrf.mxu1 }
 0x14f   : > { %v621_v22 = vpop.f32.mrf.mxu0 }
 0x155   : > { %v743_v61 = vpop.f32.mrf.mxu1 }
 0x157   : > { %v719_v48 = vpop.f32.mrf.mxu0 }
 0x15a   : > { %v523_v14 = vpop.f32.mrf.mxu3  ;;  %v669_v57 = vpop.f32.mrf.mxu2 }
 0x162   : > { %v549_v15 = vpop.f32.mrf.mxu3  ;;  %v767_v0 = vpop.f32.mrf.mxu2 }
 0x163   : > { %v550_v17 = vadd.f32 %v549_v15, %v523_v14 }
 0x16a   : > { %v573_v16 = vpop.f32.mrf.mxu3 }
 0x16b   : > { %v574_v19 = vadd.f32 %v573_v16, %v550_v17 }
 0x171   : > { %v867_v18 = vpop.trf.xlu0 }
 0x172   : > { %v884_v20 = vsel %vm496_vm10, %v867_v18, 0  ;;  %v597_v21 = vpop.f32.mrf.mxu3 }
 0x173   : > { %v2183_v23 = vand.u32 4294901760, %v884_v20  ;;  %v598_v24 = vadd.f32 %v597_v21, %v574_v19 }
 0x175   : > { %v2186_v26 = vsub.f32 %v884_v20, %v2183_v23  ;;  %v622_v27 = vadd.f32 %v621_v22, %v598_v24 }
 0x177   : > { %v2189_v28 = vand.u32 4294901760, %v2186_v26  ;;  %v644_v29 = vadd.f32 %v643_v25, %v622_v27 }
 0x179   : > { %v906_v30 = vsub.f32 %v2186_v26, %v2189_v28  ;;  %v901_v31 = vand.u32 4294901760, %v644_v29  ;;  %825 = vmatmul.f32.vlgmr.msra.gmra.mxu0 %v644_v29 }
 0x17a   : > { %v695_v54 = vpop.f32.mrf.mxu3 }
 0x17b   : > { %v2193_v32 = vand.u32 4294901760, %v906_v30  ;;  %v928_v33 = vsub.f32 %v644_v29, %v901_v31  ;;  %902 = vmatpush.msra.mxu1 %v901_v31  ;;  %v696_v5 = vadd.f32 %v695_v54, %v669_v57  ;;  %v1216_v54 = vld [vmem:[#allocation2 + $0x118] sm:$0xff]  ;;  %v1210_v57 = vld [vmem:[#allocation2 + $0xe8] sm:$0xff] }
 0x17d   : > { %978 = vmatpush.msrb.mxu1 %v901_v31  ;;  %v929_v34 = vand.u32 4294901760, %v928_v33  ;;  %955 = vmatpush.msra.mxu3 %v928_v33  ;;  %v720_v7 = vadd.f32 %v719_v48, %v696_v5  ;;  %v1189_v5 = vld [vmem:[#allocation2 + $0x40] sm:$0xff] }
 0x17e   : > { %908 = vmatmul.f32.vlgmr.msra.gmra.mxu1 %v2193_v32  ;;  %958 = vmatmul.f32.vlgmr.msra.gmra.mxu3 %v2186_v26 }
 0x17f   : > { %1026 = vmatpush.msrb.mxu3 %v901_v31  ;;  %v930_v35 = vsub.f32 %v928_v33, %v929_v34  ;;  %v744_v12 = vadd.f32 %v743_v61, %v720_v7  ;;  %v1204_v61 = vld [vmem:[#allocation2 + $0xb8] sm:$0xff]  ;;  %v1183_v7 = vld [vmem:[#allocation2 + $0x10] sm:$0xff] }
 0x181   : > { %v931_v36 = vand.u32 4294901760, %v930_v35  ;;  %v768_v18 = vadd.f32 %v767_v0, %v744_v12  ;;  %v1198_v0 = vld [vmem:[#allocation2 + $0x88] sm:$0xff] }
 0x182   : > { %v789_v63 = vpop.f32.mrf.mxu3 }
 0x183   : > { %932 = vmatpush.msra.mxu2 %v931_v36  ;;  %v790_v29 = vadd.f32 %v789_v63, %v768_v18  ;;  %v1201_v63 = vld [vmem:[#allocation2 + $0xa0] sm:$0xff] }
 0x184   : > { %934 = vmatmul.f32.vlgmr.msra.gmra.mxu2 %v2183_v23 }
 0x185   : > { %1004 = vmatpush.msrb.mxu2 %v929_v34 }
 0x186   : > { %982 = vmatmul.f32.vlgmr.msrb.gmra.mxu1 %v2189_v28  ;;  %1028 = vmatmul.f32.vlgmr.msrb.gmra.mxu3 %v2183_v23 }
 0x18c   : > { %1006 = vmatmul.f32.vlgmr.msrb.gmra.mxu2 %v2183_v23 }
 0x1f6   : > { %v826_v58 = vpop.f32.mrf.mxu0 }
 0x1f7   : > { %v829_v59 = vadd.f32 %v826_v58, %v792_v55  ;;  %v1213_v55 = vld [vmem:[#allocation2 + $0x100] sm:$0xff]  ;;  %v1194_v58 = vld [vmem:[#allocation2 + $0x68] sm:$0xff] }
 0x1f9   : > { %v1538_v62 = vmul.f32 -1.442695, %v829_v59  ;;  %v1207_v59 = vld [vmem:[#allocation2 + $0xd0] sm:$0xff] }
 0x1fb   : > { %1680 = vpow2.f32 %v1538_v62  ;;  %v909_v1 = vpop.f32.mrf.mxu1  ;;  %v1188_v62 = vld [vmem:[#allocation2 + $0x38] sm:$0xff] }
 0x201   : > { %v1681_v3 = vpop.eup %1680  ;;  %v959_v6 = vpop.f32.mrf.mxu3 }
 0x202   : > { %v833_v4 = vadd.f32 1.0, %v1681_v3  ;;  %v1195_v3 = vld [vmem:[#allocation2 + $0x70] sm:$0xff] }
 0x203   : > { %v983_v11 = vpop.f32.mrf.mxu1 }
 0x204   : > { %1682 = vrcp.f32 %v833_v4  ;;  %v845_v17 = vand.u32 2147483648, %v833_v4  ;;  %v843_v20 = vand.u32 2147483647, %v833_v4  ;;  %vm839_vm12 = vweird.f32 %v833_v4 }
 0x206   : > { %v846_v27 = vor.u32 1.1754944e-38, %v845_v17  ;;  %vm844_vm14 = vcmp.eq.f32.partialorder %v843_v20, 8.507059e+37  ;;  %v1179_v17 = vld [vmem:[%s2092_s20 + $0x8] sm:$0xff] }
 0x207   : > { %v935_v8 = vpop.f32.mrf.mxu2 }
 0x208   : > { %v936_v9 = vadd.f32 %v935_v8, %v909_v1  ;;  %v1182_v1 = vld [vmem:[#allocation2 + $0x8] sm:$0xff]  ;;  %v1178_v8 = vld [vmem:[%s2092_s20] sm:$0xff] }
 0x209   : > { %v1029_v22 = vpop.f32.mrf.mxu3 }
 0x20a   : > { %v1683_v10 = vpop.eup %1682  ;;  %v960_v14 = vadd.f32 %v959_v6, %v936_v9  ;;  %v1186_v6 = vld [vmem:[#allocation2 + $0x28] sm:$0xff] }
 0x20b   : > { %v835_v13 = vmul.f32 %v1683_v10, %v833_v4  ;;  %vm840_vm11 = vweird.f32 %v1683_v10  ;;  %v1192_v4 = vld [vmem:[#allocation2 + $0x58] sm:$0xff] }
 0x20c   : > { %v984_v16 = vadd.f32 %v983_v11, %v960_v14  ;;  %vm841_vm13 = vmor %vm839_vm12, %vm840_vm11 }
 0x20d   : > { %v836_v15 = vsub.f32 1.0, %v835_v13 }
 0x20f   : > { %v837_v19 = vmul.f32 %v1683_v10, %v836_v15  ;;  %v1007_v21 = vpop.f32.mrf.mxu2 }
 0x210   : > { %v1008_v24 = vadd.f32 %v1007_v21, %v984_v16 }
 0x211   : > { %v838_v25 = vadd.f32 %v1683_v10, %v837_v19 }
 0x212   : > { %v2203_v31 = vadd.f32 %v1029_v22, %v1008_v24 }
 0x213   : > { %v842_v30 = vsel %vm841_vm13, %v1683_v10, %v838_v25 }
 0x214   : > { %v847_v33 = vsel %vm844_vm14, %v846_v27, %v842_v30  ;;  %1245 = vmatmul.f32.vlgmr.msrb.gmra.mxu0 %v2203_v31 }
 0x215   : > { %v849_v34 = vmul.f32 %v847_v33, %v790_v29 }
 0x217   : > { %v1047_v35 = vand.u32 4294901760, %v849_v34 }
 0x219   : > { %1048 = vmatpush.msra.mxu1 %v1047_v35  ;;  %v1074_v36 = vsub.f32 %v849_v34, %v1047_v35 }
 0x21a   : > { %1054 = vmatmul.f32.vlgmr.msra.gmra.mxu1 %v2193_v32  ;;  %v1212_v32 = vld [vmem:[#allocation2 + $0xf8] sm:$0xff] }
 0x21b   : > { %1124 = vmatpush.msrb.mxu1 %v1047_v35  ;;  %1101 = vmatpush.msra.mxu3 %v1074_v36  ;;  %v1075_v39 = vand.u32 4294901760, %v1074_v36 }
 0x21c   : > { %1104 = vmatmul.f32.vlgmr.msra.gmra.mxu3 %v2186_v26  ;;  %v1888_v26 = vmov 0  }
 0x21d   : > { %1249 = vmatpush.msra.mxu1 %v1227_v37  ;;  %1172 = vmatpush.msrb.mxu3 %v1047_v35  ;;  %v1076_v42 = vsub.f32 %v1074_v36, %v1075_v39  ;;  %v1335_v48 = vsel %vm2106_vm0, 1, %v1888_v26 }
 0x21e   : > { %1679 = vset.pattern.permute.xlu0 %v1888_v26 }
 0x21f   : > { %1250 = vmatpush.msra.mxu1 %v1224_v38  ;;  %v1077_v43 = vand.u32 4294901760, %v1076_v42  ;;  %1337 = vperm.xlu0 %1679, %v1335_v48  }
 0x221   : > { %1251 = vmatpush.msra.mxu1 %v1221_v40  ;;  %1078 = vmatpush.msra.mxu2 %v1077_v43 }
 0x222   : > { %1080 = vmatmul.f32.vlgmr.msra.gmra.mxu2 %v2183_v23  ;;  %1128 = vmatmul.f32.vlgmr.msrb.gmra.mxu1 %v2189_v28  ;;  %v1203_v28 = vld [vmem:[#allocation2 + $0xb0] sm:$0xff] }
 0x223   : > { %1252 = vmatpush.msra.mxu1 %v1218_v44  ;;  %1150 = vmatpush.msrb.mxu2 %v1075_v39 }
 0x224   : > { %1174 = vmatmul.f32.vlgmr.msrb.gmra.mxu3 %v2183_v23 }
 0x225   : > { %1253 = vmatpush.msra.mxu1 %v1215_v45  ;;  %1269 = vmatpush.msra.mxu2 %v1228_v46 }
 0x227   : > { %1254 = vmatpush.msra.mxu1 %v1212_v32  ;;  %1270 = vmatpush.msra.mxu2 %v1225_v47 }
 0x229   : > { %1255 = vmatpush.msra.mxu1 %v1209_v50  ;;  %1271 = vmatpush.msra.mxu2 %v1222_v51 }
 0x22a   : > { %1152 = vmatmul.f32.vlgmr.msrb.gmra.mxu2 %v2183_v23  ;;  %v1185_v23 = vld [vmem:[#allocation2 + $0x20] sm:$0xff] }
 0x22b   : > { %1256 = vmatpush.msra.mxu1 %v1206_v52  ;;  %1272 = vmatpush.msra.mxu2 %v1219_v53 }
 0x22d   : > { %1257 = vmatpush.msra.mxu1 %v1203_v28  ;;  %1273 = vmatpush.msra.mxu2 %v1216_v54 }
 0x22f   : > { %1258 = vmatpush.msra.mxu1 %v1200_v2  ;;  %1274 = vmatpush.msra.mxu2 %v1213_v55 }
 0x231   : > { %1259 = vmatpush.msra.mxu1 %v1197_v56  ;;  %1275 = vmatpush.msra.mxu2 %v1210_v57 }
 0x233   : > { %1260 = vmatpush.msra.mxu1 %v1194_v58  ;;  %1276 = vmatpush.msra.mxu2 %v1207_v59 }
 0x235   : > { %1261 = vmatpush.msra.mxu1 %v1191_v60  ;;  %1277 = vmatpush.msra.mxu2 %v1204_v61 }
 0x237   : > { %1262 = vmatpush.msra.mxu1 %v1188_v62  ;;  %1278 = vmatpush.msra.mxu2 %v1201_v63 }
 0x239   : > { %1263 = vmatpush.msra.mxu1 %v1185_v23  ;;  %1279 = vmatpush.msra.mxu2 %v1198_v0 }
 0x23b   : > { %1264 = vmatpush.msra.mxu1 %v1182_v1  ;;  %1280 = vmatpush.msra.mxu2 %v1195_v3 }
 0x23c   : > { %1265 = vmatmul.f32.vlgmr.msra.gmra.mxu1 %v2203_v31 }
 0x23d   : > { %1281 = vmatpush.msra.mxu2 %v1192_v4 }
 0x23f   : > { %1282 = vmatpush.msra.mxu2 %v1189_v5 }
 0x241   : > { %1283 = vmatpush.msra.mxu2 %v1186_v6 }
 0x243   : > { %1284 = vmatpush.msra.mxu2 %v1183_v7 }
 0x244   : > { %1285 = vmatmul.f32.vlgmr.msra.gmra.mxu2 %v2203_v31  ;;  %v1180_v31 = vld [vmem:[%s2092_s20 + $0x10] sm:$0xff] }
 0x291   : > { %v1246_v9 = vpop.f32.mrf.mxu0  ;;  %v1338_v47 = vpop.permute.xlu0 %1337 }
 0x292   : > { %v1289_v10 = vadd.f32 %v1246_v9, %v1178_v8  ;;  %vm1339_vm3 = vcmp.eq.s32.totalorder %v1338_v47, 1 }
 0x294   : > { %v1539_v11 = vmul.f32 -1.442695, %v1289_v10 }
 0x296   : > { %1684 = vpow2.f32 %v1539_v11 }
 0x297   : > { %v1055_v12 = vpop.f32.mrf.mxu1 }
 0x29c   : > { %v1685_v13 = vpop.eup %1684 }
 0x29d   : > { %v1295_v14 = vadd.f32 1.0, %v1685_v13 }
 0x29f   : > { %v1129_v15 = vpop.f32.mrf.mxu1  ;;  %1686 = vrcp.f32 %v1295_v14  ;;  %v1105_v34 = vpop.f32.mrf.mxu3  ;;  %vm1301_vm15 = vweird.f32 %v1295_v14  ;;  %v1307_v38 = vand.u32 2147483648, %v1295_v14  ;;  %v1305_v40 = vand.u32 2147483647, %v1295_v14 }
 0x2a1   : > { %v1308_v43 = vor.u32 1.1754944e-38, %v1307_v38  ;;  %vm1306_vm2 = vcmp.eq.f32.partialorder %v1305_v40, 8.507059e+37 }
 0x2a5   : > { %v1081_v16 = vpop.f32.mrf.mxu2  ;;  %v1687_v19 = vpop.eup %1686 }
 0x2a6   : > { %v1297_v22 = vmul.f32 %v1687_v19, %v1295_v14  ;;  %v1082_v27 = vadd.f32 %v1081_v16, %v1055_v12  ;;  %vm1302_vm0 = vweird.f32 %v1687_v19 }
 0x2a7   : > { %vm1303_vm1 = vmor %vm1301_vm15, %vm1302_vm0  ;;  %v1175_v48 = vpop.f32.mrf.mxu3 }
 0x2a8   : > { %v1298_v25 = vsub.f32 1.0, %v1297_v22  ;;  %v1106_v35 = vadd.f32 %v1105_v34, %v1082_v27 }
 0x2aa   : > { %v1299_v33 = vmul.f32 %v1687_v19, %v1298_v25  ;;  %v1130_v42 = vadd.f32 %v1129_v15, %v1106_v35 }
 0x2ac   : > { %v1300_v39 = vadd.f32 %v1687_v19, %v1299_v33 }
 0x2ad   : > { %v1153_v24 = vpop.f32.mrf.mxu2 }
 0x2ae   : > { %v1154_v45 = vadd.f32 %v1153_v24, %v1130_v42  ;;  %v1304_v46 = vsel %vm1303_vm1, %v1687_v19, %v1300_v39 }
 0x2af   : > { %v1309_v51 = vsel %vm1306_vm2, %v1308_v43, %v1304_v46 }
 0x2b0   : > { %v1176_v52 = vadd.f32 %v1175_v48, %v1154_v45 }
 0x2b9   : > { %v1266_v18 = vpop.f32.mrf.mxu1 }
 0x2ba   : > { %v1290_v20 = vadd.f32 %v1266_v18, %v1179_v17 }
 0x2bc   : > { %v1540_v21 = vmul.f32 -1.442695, %v1290_v20 }
 0x2be   : > { %1688 = vpow2.f32 %v1540_v21 }
 0x2c4   : > { %v1689_v29 = vpop.eup %1688 }
 0x2c5   : > { %v1314_v30 = vadd.f32 1.0, %v1689_v29 }
 0x2c7   : > { %1690 = vrcp.f32 %v1314_v30  ;;  %v1286_v36 = vpop.f32.mrf.mxu2  ;;  %v1326_v55 = vand.u32 2147483648, %v1314_v30  ;;  %vm1320_vm5 = vweird.f32 %v1314_v30  ;;  %v1324_v57 = vand.u32 2147483647, %v1314_v30 }
 0x2c8   : > { %v1291_v37 = vadd.f32 %v1286_v36, %v1180_v31 }
 0x2c9   : > { %v1327_v59 = vor.u32 1.1754944e-38, %v1326_v55  ;;  %vm1325_vm7 = vcmp.eq.f32.partialorder %v1324_v57, 8.507059e+37 }
 0x2ca   : > { %1692 = vtanh.f32 %v1291_v37 }
 0x2cd   : > { %v1691_v44 = vpop.eup %1690 }
 0x2ce   : > { %v1316_v32 = vmul.f32 %v1691_v44, %v1314_v30  ;;  %vm1321_vm4 = vweird.f32 %v1691_v44 }
 0x2cf   : > { %vm1322_vm6 = vmor %vm1320_vm5, %vm1321_vm4 }
 0x2d0   : > { %v1693_v26 = vpop.eup %1692  ;;  %v1317_v50 = vsub.f32 1.0, %v1316_v32 }
 0x2d1   : > { %v1331_v53 = vmul.f32 %v1693_v26, %v1309_v51 }
 0x2d2   : > { %v1318_v28 = vmul.f32 %v1691_v44, %v1317_v50 }
 0x2d3   : > { %v1332_v54 = vadd.f32 %v1331_v53, %v1176_v52 }
 0x2d4   : > { %v1319_v2 = vadd.f32 %v1691_v44, %v1318_v28 }
 0x2d5   : > { %1694 = vtanh.f32 %v1332_v54  ;;  %v1341_v56 = vsel %vm1339_vm3, %v1332_v54, %v2130_v49 }
 0x2d6   : > { %1343 = vst [vmem:[%s2110_s18 + $0x8] sm:$0xff] %v1341_v56  ;;  %v1323_v58 = vsel %vm1322_vm6, %v1691_v44, %v1319_v2 }
 0x2d7   : > { %v1328_v61 = vsel %vm1325_vm7, %v1327_v59, %v1323_v58 }
 0x2db   : > { %v1695_v60 = vpop.eup %1694 }
 0x2dc   : > { %v1334_v62 = vmul.f32 %v1695_v60, %v1328_v61 }
 0x2de   : > { %v1340_v63 = vsel %vm1339_vm3, %v1334_v62, %v2122_v41 }
 0x2df   : > { %1342 = vst [vmem:[%s2110_s18] sm:$0xff] %v1340_v63 }
 0x2e0 PF: > { %s1546_s20 = sshll.u32 %s1870_s8, 4  ;;  %s2326_s26 = sld [smem:[#allocation23_spill]] }
 0x2e1   : > { %s1358_s21 = sshll.u32 %s2110_s18, 4  ;;  %s1345_s27 = scalar_lea.sflag [#allocation4], %s400_s2  ;;  %s1359_s21 = int_to_ptr.vmem [resolvable:$true] %s1358_s21 }
 0x2e6   : > { %s2327_s19 = smov %s2326_s26  ;;  %s1356_s14 = scalar_lea.hbm %s2326_s26, %s1546_s20 }
 0x2e7   : > { %s1360_s22 = sshll.u32 %s1356_s14, 4  ;;  %s1776_s8 = scalar_lea.hbm %s2327_s19, 32  ;;  %s1361_s22 = int_to_ptr.hbm [resolvable:$true] %s1360_s22 }
 0x2e8   : > { %s1770_s23 = sshra.s32 %s1361_s22, 4  ;;  %s1771_s23 = int_to_ptr.hbm [resolvable:$true] %s1770_s23 }
 0x2e9   : > { %s1772_s5 = scalar_lea.hbm %s1771_s23, 16  ;;  %p1777_p5 = scmp.lt.s32.totalorder %s1771_s23, %s2327_s19 }
 0x2ea   : > { %p1773_p13 = scmp.ne.s32.totalorder %s1771_s23, %s1772_s5  ;;  %p1778_p6 = scmp.lt.s32.totalorder %s1776_s8, %s1772_s5 }
 0x2ec   : > { %p1774_p0 = pnand %p1773_p13, %p2041_p7  ;;  %p1779_p8 = por %p1778_p6, %p1777_p5 }
 0x2ee   : > { %p1775_p3 = pneg %p1774_p0 }
 0x2f0   : > { %p1780_p9 = pnand %p1779_p8, %p1775_p3 }
 0x2f2   : > { %1783 = shalt.err (!%p1780_p9)
}
 0x2f3   : > { %1554 = dma.vmem_to_hbm [thread:$0]  (%p2041_p7), %s1359_s21, 256, %s1361_s22, %s1345_s27  }
 0x2f4 PF: > { %s2328_s2 = sld [smem:[#allocation11_spill]]  ;;  %p1571_p2 = scmp.ge.s32.totalorder %s1882_s11, 2 }
 0x2f6   : > { %p1565_p1 = pnand %p1571_p2, %p2054_p10 }
 0x2f8   : > { %p1566_p4 = pneg %p1565_p1 }
 0x2fa   : > { %s1372_s18 = sand.u32 1, %s2328_s2  }
 0x2fb   : > { %s1373_s6 = scalar_lea.sflag [#allocation4], %s1372_s18 }
 0x2fc   : > { %1837 = dma.done.wait (%p1566_p4), %s1373_s6, 256  }
 0x2fd   : > { %1839 = vsyncadd (%p1566_p4), %s1373_s6, 4294967040  ;;  %s24_s11 = sadd.s32 1, %s1882_s11   ;;  %s2329_s30 = sld [smem:[#allocation12_spill]] }
 0x2fe   : > { %p21_p11 = scmp.ge.s32.totalorder %s24_s11, 10   ;;  %s2330_s26 = sld [smem:[#allocation18_spill]] }
 0x2ff   : > { %s2331_s20 = sld [smem:[#allocation13_spill]]  ;;  %s2335_s24 = smov %s1846_s25 }
 0x300   : > { %s2332_s8 = sld [smem:[#allocation14_spill]]  ;;  %s2337_s27 = smov %s1858_s28 }
 0x301   : > { %s2333_s9 = sld [smem:[#allocation15_spill]]  ;;  %s2338_s28 = smov %s1862_s29 }
 0x302   : > { %s2334_s10 = sld [smem:[#allocation16_spill]]  ;;  %s2339_s29 = smov %s2049_s7 }
 0x303   : > { %s2336_s25 = smov %s2329_s30  ;;  %23 = sbr.rel (!%p21_p11) target bundleno = 16 (0x10), region = 118 }
 0x305   : > { %s2340_s30 = smov %s2331_s20 }
 0x308   :  { %1379 = vsyncpa [#allocation3], 1 }
 0x309   :  { %1381 = vsyncpa [#allocation3 + $0x1], 1 }
 0x30a   :  { %1382 = vsyncpa [#allocation6], 1 }
 0x30b   :  { %1384 = vsyncpa [#allocation6 + $0x1], 1 }
 0x30c   :  { %1385 = vsyncpa [#allocation4], 1 }
 0x30d   :  { %1387 = vsyncpa [#allocation4 + $0x1], 1 }

</bundles_post_ra>
